<compile_context>
chip_gen: v5e
topology: v5e:2x2
jax: 0.10.0
libtpu: 0.0.40
codegen_flags: <defaults>
</compile_context>

<pallas_src>
import jax
import jax.numpy as jnp
from jax.experimental import pallas as pl
from jax.experimental.pallas import tpu as pltpu

EPS = 1e-6
SMEM = pltpu.MemorySpace.SMEM


# ----------------------------------------------------------------------------
# helpers (match the PyTorch reference formulas)
# ----------------------------------------------------------------------------
def wnorm1(w):                       # weightNormalize1: w^2 / sum(w^2)
    return w ** 2 / jnp.sum(w ** 2)


def _log_sigmoid(v):
    # Numerically stable LogSigmoid:  min(v, 0) - log(1 + exp(-|v|)).
    # Uses only exp/log/abs/min (all supported by Mosaic elementwise lowering).
    return jnp.minimum(v, 0.0) - jnp.log(1.0 + jnp.exp(-jnp.abs(v)))


def _pick_fs(nf, cap=128):
    """Sublane tile (multiple of 8) dividing nf, as large as possible up to
    `cap`, preferring >= 2 grid steps (v7x megacore sharding of the F axis)."""
    if nf % 8 != 0 or nf <= 8:
        return nf                                    # full-extent block (legal)
    cands = [fs for fs in range(8, min(nf, cap) + 1, 8) if nf % fs == 0]
    multi = [fs for fs in cands if nf // fs >= 2]
    return max(multi) if multi else max(cands)


# ----------------------------------------------------------------------------
# Pallas kernel: weighted SURE distance + running min over class rows.
#   grid = (F_tiles,)  -- one "parallel" axis; class loop is internal.
# ----------------------------------------------------------------------------
def _sure_kernel(x_ref,        # (B, 4, FS, 128)  [theta, mag, x, y]
                 miu_ref,      # (D, 2, FS, 128)  [theta, mag]
                 fsw_ref,      # (Ce, D)  SMEM : frac_s * w1n
                 ema_ref,      # (Ce, D)  SMEM : exp(frac_t * ls(1+eps) * w1n)
                 tconst_ref,   # (Ce,)    SMEM : sum_d frac_t * w1n
                 wsq_ref,      # (3,)     SMEM : weight ** 2
                 out_ref):     # (B, FS, 128)
    Ce, D = fsw_ref.shape
    w_rot = wsq_ref[0]
    w_abs = wsq_ref[1]
    w_xy = wsq_ref[2]

    # ---- class-invariant work (once per F tile) ------------------------------
    x_theta = x_ref[:, 0, :, :]                       # (B, FS, 128)
    x_mag = x_ref[:, 1, :, :]
    dx = x_ref[:, 2, :, :] - 1.0                      # X_LEs_xy / X_weights == 1.0
    dy = x_ref[:, 3, :, :] - 1.0
    base = w_xy * (dx * dx + dy * dy)                 # (B, FS, 128)
    log_xmag = jnp.log(x_mag)                         # hoisted out of class loop

    miu_t = miu_ref[:, 0, :, :]                       # (D, FS, 128)
    ls_m = _log_sigmoid(miu_ref[:, 1, :, :] + EPS)    # (D, FS, 128)

    # ---- per-class distances + running min (Ce and D tiny -> unrolled) -------
    result = None
    for c in range(Ce):
        # d = 0 term initializes the accumulators (no zeros+broadcast)
        means_t = tconst_ref[c] + fsw_ref[c, 0] * miu_t[0]                 # (FS,128)
        means_m = ema_ref[c, 0] * jnp.exp(fsw_ref[c, 0] * ls_m[0])
        for d in range(1, D):
            means_t = means_t + fsw_ref[c, d] * miu_t[d]
            means_m = means_m + ema_ref[c, d] * jnp.exp(fsw_ref[c, d] * ls_m[d])
        dist = (base
                + w_rot * jnp.abs(x_theta - means_t)                        # SOmetric
                + w_abs * jnp.abs(log_xmag - jnp.log(means_m + EPS)))       # P1metric
        result = dist if result is None else jnp.minimum(result, dist)
    out_ref[...] = result                             # == -MaxPool1d(-dist)


# ----------------------------------------------------------------------------
# forward wrapper (labels=None path of SURE_pure4D.forward)
# ----------------------------------------------------------------------------
def sure_forward(x_le, P, cfg):
    B, feat, Cc, H, W = x_le.shape
    assert feat == 4, "SURE_pure4D expects 4 feature channels [theta, mag, x, y]"
    ncls, D = cfg["num_classes"], cfg["num_distr"]
    F = Cc * H * W

    # Free reshapes (no transpose, no per-feature copies); pad F to a lane
    # multiple so the output is lane-dense (unmasked stores).
    x = x_le.astype(jnp.float32).reshape(B, 4, F)
    miu = P["miu"].astype(jnp.float32).reshape(D, 2, F)
    F_pad = ((F + 127) // 128) * 128
    if F_pad != F:
        pad = F_pad - F
        x = jnp.pad(x, ((0, 0), (0, 0), (0, pad)), constant_values=1.0)
        miu = jnp.pad(miu, ((0, 0), (0, 0), (0, pad)), constant_values=1.0)
    NF = F_pad // 128
    x = x.reshape(B, 4, NF, 128)
    miu = miu.reshape(D, 2, NF, 128)

    # ---- tiny per-class / per-distribution scalars (plain JAX, via SMEM) ----
    # labels=None path: X_LEs / X_weights == X_LEs_xy / X_weights == 1.0 and
    # sigmas == 1, so frac_t / frac_s (hence every per-class row below) are
    # identical for all classes and the min over classes is an exact no-op.
    # Collapse the class tables to a single row (Ce = 1); the kernel loops
    # over however many rows it is given.
    tao_sq = P["tao"].astype(jnp.float32) ** 2                 # (D,)   sigma == 1
    frac_t = tao_sq / (1.0 + tao_sq)                           # (D,)
    frac_s = 1.0 / (1.0 + tao_sq)                              # (D,)
    w1n = wnorm1(P["w1"].astype(jnp.float32))                  # forward reuses w1 for w2
    ls1 = _log_sigmoid(jnp.float32(1.0 + EPS))                 # ls(x_LE_out + eps)

    fsw = (frac_s * w1n)[None, :]                              # (1, D)
    ema = jnp.exp(frac_t * ls1 * w1n)[None, :]                 # (1, D)
    tconst = jnp.sum(frac_t * w1n)[None]                       # (1,)
    wsq = P["weight"].astype(jnp.float32) ** 2                 # (3,)

    FS = _pick_fs(NF)
    grid = (NF // FS,)

    x_spec = pl.BlockSpec((B, 4, FS, 128), lambda i: (0, 0, i, 0))
    miu_spec = pl.BlockSpec((D, 2, FS, 128), lambda i: (0, 0, i, 0))
    smem_spec = pl.BlockSpec(memory_space=SMEM)
    out_spec = pl.BlockSpec((B, FS, 128), lambda i: (0, i, 0))

    out = pl.pallas_call(
        _sure_kernel,
        out_shape=jax.ShapeDtypeStruct((B, NF, 128), jnp.float32),
        grid=grid,
        in_specs=[x_spec, miu_spec, smem_spec, smem_spec, smem_spec, smem_spec],
        out_specs=out_spec,
        compiler_params=pltpu.CompilerParams(
            dimension_semantics=("parallel",),
            vmem_limit_bytes=32 * 1024 * 1024),
    )(x, miu, fsw, ema, tconst, wsq)

    out = out.reshape(B, F_pad)[:, :F].reshape(B, Cc, H, W)
    return out, None                                           # loss is None


# ----------------------------------------------------------------------------
# pure-JAX reference (direct translation of the PyTorch forward, labels=None)
# ----------------------------------------------------------------------------
def ref_forward(x_le, P, cfg):
    B, feat, Cc, H, W = x_le.shape
    ncls, D = cfg["num_classes"], cfg["num_distr"]
    x = x_le.astype(jnp.float32)
    x_xy = x[:, 2:]
    x2 = x[:, :2]
    shapes = (ncls, 2, Cc, H, W)

    X_LEs = jnp.zeros(shapes, jnp.float32) + EPS
    X_w = jnp.zeros((ncls, 1), jnp.float32) + EPS
    x_le_out = (X_LEs.reshape(ncls, -1) / X_w).reshape(shapes)
    x_le_exp = jnp.tile(x_le_out[:, None], (1, D, 1, 1, 1, 1))      # (C,D,2,Cc,H,W)

    sigmas = jnp.ones((ncls,), jnp.float32)
    tao_sq = jnp.tile((P["tao"] ** 2)[None, :], (ncls, 1))
    sig_sq = jnp.tile((sigmas ** 2)[:, None], (1, D))
    w1 = wnorm1(P["w1"])
    w2 = wnorm1(P["w1"])                                            # module reuses w1

    mag_x = x_le_exp[:, :, 1]
    ft = (tao_sq / (sig_sq + tao_sq))[..., None, None, None]
    fs = (sig_sq / (sig_sq + tao_sq))[..., None, None, None]
    x_mag = ft * _log_sigmoid(mag_x + EPS)
    miu_rep = jnp.tile(P["miu"][None], (ncls, 1, 1, 1, 1, 1))       # (C,D,2,Cc,H,W)
    miu_mag = fs * _log_sigmoid(miu_rep[:, :, 1] + EPS)
    means_mag = jnp.sum(
        jnp.exp((x_mag + miu_mag) * w1[None, :, None, None, None]), axis=1)
    x_th = mag_x * ft
    miu_th = miu_rep[:, :, 0] * fs
    means_th = jnp.sum((x_th + miu_th) * w2[None, :, None, None, None], axis=1)
    means = jnp.stack([means_th, means_mag], axis=1)                # (C,2,Cc,H,W)
    means_e = jnp.tile(means[:, None], (1, B, 1, 1, 1, 1))          # (C,B,2,Cc,H,W)
    xr = jnp.tile(x2[None], (ncls, 1, 1, 1, 1, 1))
    d_rot = jnp.abs(xr[:, :, 0] - means_e[:, :, 0])
    d_abs = jnp.abs(jnp.log(xr[:, :, 1] / (means_e[:, :, 1] + EPS)))
    x_xy_out = (X_LEs.reshape(ncls, -1) / X_w).reshape(shapes)      # eps-filled -> 1.0
    x_xy_out_e = jnp.tile(x_xy_out[:, None], (1, B, 1, 1, 1, 1))
    x_xy_r = jnp.tile(x_xy[None], (ncls, 1, 1, 1, 1, 1))
    d_xy = jnp.sum((x_xy_r - x_xy_out_e) ** 2, axis=2)              # (C,B,Cc,H,W)
    w = P["weight"]
    dist = w[0] ** 2 * d_rot + w[1] ** 2 * d_abs + w[2] ** 2 * d_xy
    return jnp.min(dist, axis=0), None


# ----------------------------------------------------------------------------
if __name__ == "__main__":
    B, Cc, H, W = 2, 8, 16, 16          # in_channel == out_channels == Cc
    num_classes, num_distr = 3, 4
    cfg = dict(num_classes=num_classes, num_distr=num_distr)

    ks = jax.random.split(jax.random.PRNGKey(0), 6)
    U = lambda k, s: jax.random.uniform(k, s, jnp.float32)
    P = {
        "w1": U(ks[0], (num_distr,)),
        "w2": U(ks[1], (num_distr,)),                  # unused: forward reuses w1
        "miu": U(ks[2], (num_distr, 2, Cc, H, W)),     # [num_distr] + input_shapes
        "tao": U(ks[3], (num_distr,)),
        "weight": U(ks[4], (3,)),
    }
    x_LE = U(ks[5], (B, 4, Cc, H, W))                  # [theta, mag, x, y]

    out, loss = sure_forward(x_LE, P, cfg)
    out = jax.block_until_ready(out)

    assert out.shape == (B, Cc, H, W)
    assert loss is None
    assert bool(jnp.all(jnp.isfinite(out)))

    ref, _ = ref_forward(x_LE, P, cfg)
    assert jnp.allclose(out, ref, rtol=1e-4, atol=1e-5), \
        float(jnp.max(jnp.abs(out - ref)))

    print("KERNEL_OK")
</pallas_src>

<mosaic_0001>
module attributes {stable_mosaic.version = 11 : i64} {
  func.func @_sure_kernel(%arg0: i32, %arg1: memref<2x4x8x128xf32, #tpu.memory_space<vmem>>, %arg2: memref<4x2x8x128xf32, #tpu.memory_space<vmem>>, %arg3: memref<1x4xf32, #tpu.memory_space<smem>>, %arg4: memref<1x4xf32, #tpu.memory_space<smem>>, %arg5: memref<1xf32, #tpu.memory_space<smem>>, %arg6: memref<3xf32, #tpu.memory_space<smem>>, %arg7: memref<2x8x128xf32, #tpu.memory_space<vmem>>) attributes {dimension_semantics = [#tpu.dimension_semantics<parallel>], iteration_bounds = array<i64: 2>, scalar_prefetch = 0 : i64, scratch_operands = 0 : i64, tpu.core_type = #tpu.core_type<tc>, window_params = [{transform_indices = @transform_0, window_bounds = array<i64: 2, 4, 8, 128>}, {transform_indices = @transform_1, window_bounds = array<i64: 4, 2, 8, 128>}, {transform_indices = @transform_2, window_bounds = array<i64: 1, 4>}, {transform_indices = @transform_3, window_bounds = array<i64: 1, 4>}, {transform_indices = @transform_4, window_bounds = array<i64: 1>}, {transform_indices = @transform_5, window_bounds = array<i64: 3>}, {transform_indices = @transform_6, window_bounds = array<i64: 2, 8, 128>}]} {
    %c0 = arith.constant 0 : index
    %0 = memref.load %arg6[%c0] : memref<3xf32, #tpu.memory_space<smem>>
    %c1 = arith.constant 1 : index
    %1 = memref.load %arg6[%c1] : memref<3xf32, #tpu.memory_space<smem>>
    %c2 = arith.constant 2 : index
    %2 = memref.load %arg6[%c2] : memref<3xf32, #tpu.memory_space<smem>>
    %c0_0 = arith.constant 0 : index
    %c0_1 = arith.constant 0 : index
    %c0_2 = arith.constant 0 : index
    %c0_3 = arith.constant 0 : index
    %3 = vector.load %arg1[%c0_0, %c0_1, %c0_2, %c0_3] : memref<2x4x8x128xf32, #tpu.memory_space<vmem>>, vector<2x1x8x128xf32>
    %4 = vector.shape_cast %3 : vector<2x1x8x128xf32> to vector<2x8x128xf32>
    %c0_4 = arith.constant 0 : index
    %c1_5 = arith.constant 1 : index
    %c0_6 = arith.constant 0 : index
    %c0_7 = arith.constant 0 : index
    %5 = vector.load %arg1[%c0_4, %c1_5, %c0_6, %c0_7] : memref<2x4x8x128xf32, #tpu.memory_space<vmem>>, vector<2x1x8x128xf32>
    %6 = vector.shape_cast %5 : vector<2x1x8x128xf32> to vector<2x8x128xf32>
    %c0_8 = arith.constant 0 : index
    %c2_9 = arith.constant 2 : index
    %c0_10 = arith.constant 0 : index
    %c0_11 = arith.constant 0 : index
    %7 = vector.load %arg1[%c0_8, %c2_9, %c0_10, %c0_11] : memref<2x4x8x128xf32, #tpu.memory_space<vmem>>, vector<2x1x8x128xf32>
    %8 = vector.shape_cast %7 : vector<2x1x8x128xf32> to vector<2x8x128xf32>
    %cst = arith.constant 1.000000e+00 : f32
    %9 = vector.broadcast %cst : f32 to vector<2x8x128xf32>
    %10 = arith.subf %8, %9 : vector<2x8x128xf32>
    %c0_12 = arith.constant 0 : index
    %c3 = arith.constant 3 : index
    %c0_13 = arith.constant 0 : index
    %c0_14 = arith.constant 0 : index
    %11 = vector.load %arg1[%c0_12, %c3, %c0_13, %c0_14] : memref<2x4x8x128xf32, #tpu.memory_space<vmem>>, vector<2x1x8x128xf32>
    %12 = vector.shape_cast %11 : vector<2x1x8x128xf32> to vector<2x8x128xf32>
    %cst_15 = arith.constant 1.000000e+00 : f32
    %13 = vector.broadcast %cst_15 : f32 to vector<2x8x128xf32>
    %14 = arith.subf %12, %13 : vector<2x8x128xf32>
    %15 = arith.mulf %10, %10 : vector<2x8x128xf32>
    %16 = arith.mulf %14, %14 : vector<2x8x128xf32>
    %17 = arith.addf %15, %16 : vector<2x8x128xf32>
    %18 = vector.broadcast %2 : f32 to vector<2x8x128xf32>
    %19 = arith.mulf %18, %17 : vector<2x8x128xf32>
    %20 = math.log %6 : vector<2x8x128xf32>
    %c0_16 = arith.constant 0 : index
    %c0_17 = arith.constant 0 : index
    %c0_18 = arith.constant 0 : index
    %c0_19 = arith.constant 0 : index
    %21 = vector.load %arg2[%c0_16, %c0_17, %c0_18, %c0_19] : memref<4x2x8x128xf32, #tpu.memory_space<vmem>>, vector<4x1x8x128xf32>
    %22 = vector.shape_cast %21 : vector<4x1x8x128xf32> to vector<4x8x128xf32>
    %c0_20 = arith.constant 0 : index
    %c1_21 = arith.constant 1 : index
    %c0_22 = arith.constant 0 : index
    %c0_23 = arith.constant 0 : index
    %23 = vector.load %arg2[%c0_20, %c1_21, %c0_22, %c0_23] : memref<4x2x8x128xf32, #tpu.memory_space<vmem>>, vector<4x1x8x128xf32>
    %24 = vector.shape_cast %23 : vector<4x1x8x128xf32> to vector<4x8x128xf32>
    %cst_24 = arith.constant 9.99999997E-7 : f32
    %25 = vector.broadcast %cst_24 : f32 to vector<4x8x128xf32>
    %26 = arith.addf %24, %25 : vector<4x8x128xf32>
    %cst_25 = arith.constant 0.000000e+00 : f32
    %27 = vector.broadcast %cst_25 : f32 to vector<4x8x128xf32>
    %28 = arith.minimumf %26, %27 : vector<4x8x128xf32>
    %29 = math.absf %26 : vector<4x8x128xf32>
    %cst_26 = arith.constant 0.000000e+00 : f32
    %30 = vector.broadcast %cst_26 : f32 to vector<4x8x128xf32>
    %31 = arith.subf %30, %29 : vector<4x8x128xf32>
    %32 = math.exp %31 : vector<4x8x128xf32>
    %cst_27 = arith.constant 1.000000e+00 : f32
    %33 = vector.broadcast %cst_27 : f32 to vector<4x8x128xf32>
    %34 = arith.addf %33, %32 : vector<4x8x128xf32>
    %35 = math.log %34 : vector<4x8x128xf32>
    %36 = arith.subf %28, %35 : vector<4x8x128xf32>
    %c0_28 = arith.constant 0 : index
    %37 = memref.load %arg5[%c0_28] : memref<1xf32, #tpu.memory_space<smem>>
    %c0_29 = arith.constant 0 : index
    %c0_30 = arith.constant 0 : index
    %38 = memref.load %arg3[%c0_29, %c0_30] : memref<1x4xf32, #tpu.memory_space<smem>>
    %39 = vector.extract_strided_slice %22 {offsets = [0, 0, 0], sizes = [1, 8, 128], strides = [1, 1, 1]} : vector<4x8x128xf32> to vector<1x8x128xf32>
    %40 = vector.shape_cast %39 : vector<1x8x128xf32> to vector<8x128xf32>
    %41 = vector.broadcast %38 : f32 to vector<8x128xf32>
    %42 = arith.mulf %41, %40 : vector<8x128xf32>
    %43 = vector.broadcast %37 : f32 to vector<8x128xf32>
    %44 = arith.addf %43, %42 : vector<8x128xf32>
    %c0_31 = arith.constant 0 : index
    %c0_32 = arith.constant 0 : index
    %45 = memref.load %arg4[%c0_31, %c0_32] : memref<1x4xf32, #tpu.memory_space<smem>>
    %c0_33 = arith.constant 0 : index
    %c0_34 = arith.constant 0 : index
    %46 = memref.load %arg3[%c0_33, %c0_34] : memref<1x4xf32, #tpu.memory_space<smem>>
    %47 = vector.extract_strided_slice %36 {offsets = [0, 0, 0], sizes = [1, 8, 128], strides = [1, 1, 1]} : vector<4x8x128xf32> to vector<1x8x128xf32>
    %48 = vector.shape_cast %47 : vector<1x8x128xf32> to vector<8x128xf32>
    %49 = vector.broadcast %46 : f32 to vector<8x128xf32>
    %50 = arith.mulf %49, %48 : vector<8x128xf32>
    %51 = math.exp %50 : vector<8x128xf32>
    %52 = vector.broadcast %45 : f32 to vector<8x128xf32>
    %53 = arith.mulf %52, %51 : vector<8x128xf32>
    %c0_35 = arith.constant 0 : index
    %c1_36 = arith.constant 1 : index
    %54 = memref.load %arg3[%c0_35, %c1_36] : memref<1x4xf32, #tpu.memory_space<smem>>
    %55 = vector.extract_strided_slice %22 {offsets = [1, 0, 0], sizes = [1, 8, 128], strides = [1, 1, 1]} : vector<4x8x128xf32> to vector<1x8x128xf32>
    %56 = vector.shape_cast %55 : vector<1x8x128xf32> to vector<8x128xf32>
    %57 = vector.broadcast %54 : f32 to vector<8x128xf32>
    %58 = arith.mulf %57, %56 : vector<8x128xf32>
    %59 = arith.addf %44, %58 : vector<8x128xf32>
    %c0_37 = arith.constant 0 : index
    %c1_38 = arith.constant 1 : index
    %60 = memref.load %arg4[%c0_37, %c1_38] : memref<1x4xf32, #tpu.memory_space<smem>>
    %c0_39 = arith.constant 0 : index
    %c1_40 = arith.constant 1 : index
    %61 = memref.load %arg3[%c0_39, %c1_40] : memref<1x4xf32, #tpu.memory_space<smem>>
    %62 = vector.extract_strided_slice %36 {offsets = [1, 0, 0], sizes = [1, 8, 128], strides = [1, 1, 1]} : vector<4x8x128xf32> to vector<1x8x128xf32>
    %63 = vector.shape_cast %62 : vector<1x8x128xf32> to vector<8x128xf32>
    %64 = vector.broadcast %61 : f32 to vector<8x128xf32>
    %65 = arith.mulf %64, %63 : vector<8x128xf32>
    %66 = math.exp %65 : vector<8x128xf32>
    %67 = vector.broadcast %60 : f32 to vector<8x128xf32>
    %68 = arith.mulf %67, %66 : vector<8x128xf32>
    %69 = arith.addf %53, %68 : vector<8x128xf32>
    %c0_41 = arith.constant 0 : index
    %c2_42 = arith.constant 2 : index
    %70 = memref.load %arg3[%c0_41, %c2_42] : memref<1x4xf32, #tpu.memory_space<smem>>
    %71 = vector.extract_strided_slice %22 {offsets = [2, 0, 0], sizes = [1, 8, 128], strides = [1, 1, 1]} : vector<4x8x128xf32> to vector<1x8x128xf32>
    %72 = vector.shape_cast %71 : vector<1x8x128xf32> to vector<8x128xf32>
    %73 = vector.broadcast %70 : f32 to vector<8x128xf32>
    %74 = arith.mulf %73, %72 : vector<8x128xf32>
    %75 = arith.addf %59, %74 : vector<8x128xf32>
    %c0_43 = arith.constant 0 : index
    %c2_44 = arith.constant 2 : index
    %76 = memref.load %arg4[%c0_43, %c2_44] : memref<1x4xf32, #tpu.memory_space<smem>>
    %c0_45 = arith.constant 0 : index
    %c2_46 = arith.constant 2 : index
    %77 = memref.load %arg3[%c0_45, %c2_46] : memref<1x4xf32, #tpu.memory_space<smem>>
    %78 = vector.extract_strided_slice %36 {offsets = [2, 0, 0], sizes = [1, 8, 128], strides = [1, 1, 1]} : vector<4x8x128xf32> to vector<1x8x128xf32>
    %79 = vector.shape_cast %78 : vector<1x8x128xf32> to vector<8x128xf32>
    %80 = vector.broadcast %77 : f32 to vector<8x128xf32>
    %81 = arith.mulf %80, %79 : vector<8x128xf32>
    %82 = math.exp %81 : vector<8x128xf32>
    %83 = vector.broadcast %76 : f32 to vector<8x128xf32>
    %84 = arith.mulf %83, %82 : vector<8x128xf32>
    %85 = arith.addf %69, %84 : vector<8x128xf32>
    %c0_47 = arith.constant 0 : index
    %c3_48 = arith.constant 3 : index
    %86 = memref.load %arg3[%c0_47, %c3_48] : memref<1x4xf32, #tpu.memory_space<smem>>
    %87 = vector.extract_strided_slice %22 {offsets = [3, 0, 0], sizes = [1, 8, 128], strides = [1, 1, 1]} : vector<4x8x128xf32> to vector<1x8x128xf32>
    %88 = vector.shape_cast %87 : vector<1x8x128xf32> to vector<8x128xf32>
    %89 = vector.broadcast %86 : f32 to vector<8x128xf32>
    %90 = arith.mulf %89, %88 : vector<8x128xf32>
    %91 = arith.addf %75, %90 : vector<8x128xf32>
    %c0_49 = arith.constant 0 : index
    %c3_50 = arith.constant 3 : index
    %92 = memref.load %arg4[%c0_49, %c3_50] : memref<1x4xf32, #tpu.memory_space<smem>>
    %c0_51 = arith.constant 0 : index
    %c3_52 = arith.constant 3 : index
    %93 = memref.load %arg3[%c0_51, %c3_52] : memref<1x4xf32, #tpu.memory_space<smem>>
    %94 = vector.extract_strided_slice %36 {offsets = [3, 0, 0], sizes = [1, 8, 128], strides = [1, 1, 1]} : vector<4x8x128xf32> to vector<1x8x128xf32>
    %95 = vector.shape_cast %94 : vector<1x8x128xf32> to vector<8x128xf32>
    %96 = vector.broadcast %93 : f32 to vector<8x128xf32>
    %97 = arith.mulf %96, %95 : vector<8x128xf32>
    %98 = math.exp %97 : vector<8x128xf32>
    %99 = vector.broadcast %92 : f32 to vector<8x128xf32>
    %100 = arith.mulf %99, %98 : vector<8x128xf32>
    %101 = arith.addf %85, %100 : vector<8x128xf32>
    %102 = vector.shape_cast %91 : vector<8x128xf32> to vector<1x8x128xf32>
    %103 = vector.broadcast %102 : vector<1x8x128xf32> to vector<2x8x128xf32>
    %104 = arith.subf %4, %103 : vector<2x8x128xf32>
    %105 = math.absf %104 : vector<2x8x128xf32>
    %106 = vector.broadcast %0 : f32 to vector<2x8x128xf32>
    %107 = arith.mulf %106, %105 : vector<2x8x128xf32>
    %108 = arith.addf %19, %107 : vector<2x8x128xf32>
    %cst_53 = arith.constant 9.99999997E-7 : f32
    %109 = vector.broadcast %cst_53 : f32 to vector<8x128xf32>
    %110 = arith.addf %101, %109 : vector<8x128xf32>
    %111 = math.log %110 : vector<8x128xf32>
    %112 = vector.shape_cast %111 : vector<8x128xf32> to vector<1x8x128xf32>
    %113 = vector.broadcast %112 : vector<1x8x128xf32> to vector<2x8x128xf32>
    %114 = arith.subf %20, %113 : vector<2x8x128xf32>
    %115 = math.absf %114 : vector<2x8x128xf32>
    %116 = vector.broadcast %1 : f32 to vector<2x8x128xf32>
    %117 = arith.mulf %116, %115 : vector<2x8x128xf32>
    %118 = arith.addf %108, %117 : vector<2x8x128xf32>
    %c0_54 = arith.constant 0 : index
    %c0_55 = arith.constant 0 : index
    %c0_56 = arith.constant 0 : index
    %119 = vector.load %arg7[%c0_54, %c0_55, %c0_56] : memref<2x8x128xf32, #tpu.memory_space<vmem>>, vector<2x8x128xf32>
    tpu.vector_store %arg7[%c0_54, %c0_55, %c0_56], %118 {strides = array<i32>} : memref<2x8x128xf32, #tpu.memory_space<vmem>>, vector<2x8x128xf32>,
    return
  }
  func.func @transform_0(%arg0: i32) -> (i32, i32, i32, i32) {
    %c0_i32 = arith.constant 0 : i32
    %c0_i32_0 = arith.constant 0 : i32
    %c0_i32_1 = arith.constant 0 : i32
    %c0_i32_2 = arith.constant 0 : i32
    return %c0_i32, %c0_i32_0, %arg0, %c0_i32_1 : i32, i32, i32, i32
  }
  func.func @transform_1(%arg0: i32) -> (i32, i32, i32, i32) {
    %c0_i32 = arith.constant 0 : i32
    %c0_i32_0 = arith.constant 0 : i32
    %c0_i32_1 = arith.constant 0 : i32
    %c0_i32_2 = arith.constant 0 : i32
    return %c0_i32, %c0_i32_0, %arg0, %c0_i32_1 : i32, i32, i32, i32
  }
  func.func @transform_2(%arg0: i32) -> (i32, i32) {
    %c0_i32 = arith.constant 0 : i32
    %c0_i32_0 = arith.constant 0 : i32
    %c0_i32_1 = arith.constant 0 : i32
    return %c0_i32, %c0_i32_0 : i32, i32
  }
  func.func @transform_3(%arg0: i32) -> (i32, i32) {
    %c0_i32 = arith.constant 0 : i32
    %c0_i32_0 = arith.constant 0 : i32
    %c0_i32_1 = arith.constant 0 : i32
    return %c0_i32, %c0_i32_0 : i32, i32
  }
  func.func @transform_4(%arg0: i32) -> i32 {
    %c0_i32 = arith.constant 0 : i32
    %c0_i32_0 = arith.constant 0 : i32
    return %c0_i32 : i32
  }
  func.func @transform_5(%arg0: i32) -> i32 {
    %c0_i32 = arith.constant 0 : i32
    %c0_i32_0 = arith.constant 0 : i32
    return %c0_i32 : i32
  }
  func.func @transform_6(%arg0: i32) -> (i32, i32, i32) {
    %c0_i32 = arith.constant 0 : i32
    %c0_i32_0 = arith.constant 0 : i32
    %c0_i32_1 = arith.constant 0 : i32
    return %c0_i32, %arg0, %c0_i32_0 : i32, i32, i32
  }
}

</mosaic_0001>

<bundles_post_ra>
// kernel: tpu_custom_call.1
= control target key start
LH: loop header
LB: loop body
LE: loop exit
PB: predicated region body
PF: predicated region fallthrough
CT: control target
= control target key end

     0   :  { %s1270_s0 = inlined_call_operand.hbm [shape: f32[2,4,16,128], index: 0, kind: input, shape index: {}]   ;;  %s1271_s1 = inlined_call_operand.hbm [shape: f32[4,2,16,128], index: 1, kind: input, shape index: {}]   ;;  %s1272_s2 = inlined_call_operand.vmem [shape: f32[1,4], index: 2, kind: input, shape index: {}]   ;;  %s1273_s3 = inlined_call_operand.vmem [shape: f32[1,4], index: 3, kind: input, shape index: {}]   ;;  %s1274_s4 = inlined_call_operand.<no memory space> [shape: f32[1], index: 4, kind: input, shape index: {}]   ;;  %s1275_s5 = inlined_call_operand.vmem [shape: f32[3], index: 5, kind: input, shape index: {}]   ;;  %s1276_s6 = inlined_call_operand.hbm [shape: f32[2,16,128], index: 6, kind: output, shape index: {}]  }
   0x1   :  { %1279 = sst [smem:[#allocation20_spill]] %s1270_s0 }
   0x2   :  { %1280 = sst [smem:[#allocation21_spill]] %s1272_s2 }
   0x3   :  { %1281 = sst [smem:[#allocation22_spill]] %s1273_s3 }
   0x4   :  { %1282 = sst [smem:[#allocation23_spill]] %s1275_s5 }
   0x5   :  { %11 = sst [smem:[#allocation2]] %s1274_s4 }
   0x6   :  { %12 = vsyncpa [#allocation4], 0 }
   0x7   :  { %14 = vsyncpa [#allocation4 + $0x1], 0 }
   0x8   :  { %15 = vsyncpa [#allocation8], 0 }
   0x9   :  { %17 = vsyncpa [#allocation8 + $0x1], 0 }
   0xa   :  { %18 = vsyncpa [#allocation6], 0 }
   0xb   :  { %19 = vsyncpa [#allocation11], 0 }
   0xc   :  { %20 = vsyncpa [#allocation5], 0 }
   0xd   :  { %22 = vsyncpa [#allocation5 + $0x1], 0  ;;  %s1035_s23 = smov 0   ;;  %s1037_s24 = smov 0  }
   0xe   :  { %s1039_s25 = smov 0   ;;  %s1041_s26 = smov 0  }
   0xf LB: > { %s1056_s4 = sadd.s32 4294967295, %s986_s26   ;;  %s642_s27 = sadd.s32 4294967294, %s986_s26   ;;  %s986_s26 = sphi %s1041_s26, %s1301_s26   ;;  %s982_s25 = sphi %s1039_s25, %s1300_s25   ;;  %s978_s24 = sphi %s1037_s24, %s1299_s24   ;;  %s974_s23 = sphi %s1035_s23, %s1298_s23  }
  0x10   : > { %s1060_s28 = sadd.s32 1, %s986_s26   ;;  %s35_s29 = sadd.s32 1, %s982_s25 }
  0x11   : > { %s32_s30 = ssub.s32 %s986_s26, %s1060_s28  ;;  %p42_p0 = scmp.ne.s32.totalorder %s982_s25, %s978_s24 }
  0x12   : > { %p33_p1 = scmp.eq.s32.totalorder %s32_s30, 0  ;;  %p43_p2 = scmp.eq.s32.totalorder %s986_s26, 0 }
  0x13   : > { %p48_p3 = scmp.ne.s32.totalorder %s978_s24, %s974_s23  ;;  %p49_p4 = scmp.eq.s32.totalorder %s1056_s4, 0 }
  0x14   : > { %s1072_s7 = scalar_select %p33_p1, %s982_s25, %s35_s29  }
  0x15   : > { %p1074_p5 = por %p43_p2, %p42_p0  ;;  %p1080_p6 = por %p49_p4, %p48_p3 }
  0x16   : > { %1283 = sst [smem:[#allocation19_spill]] %s1072_s7  ;;  %p182_p7 = scmp.eq.s32.totalorder %s1056_s4, 1 }
  0x17   : > { %p188_p8 = scmp.eq.s32.totalorder %s642_s27, 1  ;;  %p643_p9 = scmp.ge.s32.totalorder %s986_s26, 1 }
  0x18   : > { %p195_p10 = scmp.lt.s32.totalorder %s986_s26, 3  ;;  %p1087_p11 = por %p182_p7, %p42_p0 }
  0x19   : > { %p1091_p12 = por %p188_p8, %p48_p3  ;;  %s1289_s3 = sld [smem:[#allocation22_spill]] }
  0x1a   : > { %p1095_p13 = pnand %p643_p9, %p195_p10  ;;  %p727_p2 = scmp.lt.s32.totalorder %s986_s26, 2 }
  0x1b   : > { %s1290_s2 = sld [smem:[#allocation21_spill]]  ;;  %s988_s20 = smov [#allocation10]  }
  0x1c   : > { %p703_p1 = pneg %p1095_p13  ;;  %p1113_p7 = pnand %p727_p2, %p1074_p5 }
  0x1d   : > { %s1292_s5 = sld [smem:[#allocation23_spill]]  ;;  %s989_s29 = smov [#allocation9]  }
  0x1e   : > { %p704_p3 = pnand %p703_p1, %p49_p4  ;;  %s990_s30 = smov [#allocation12]  }
  0x1f   : > { %s217_s15 = sshll.u32 %s1289_s3, 4  ;;  %s1121_s13 = sand.u32 1, %s982_s25   ;;  %s218_s15 = int_to_ptr.vmem [resolvable:$true] %s217_s15 }
  0x20   : > { %709 = dma.vmem_to_smem (!%p704_p3), %s218_s15, 16, %s988_s20, [#allocation11]  }
  0x21   : > { %s207_s18 = sshll.u32 %s1290_s2, 4  ;;  %s1278_s8 = sshll.u32 %s986_s26, 3  ;;  %s208_s18 = int_to_ptr.vmem [resolvable:$true] %s207_s18 }
  0x22   : > { %706 = dma.vmem_to_smem (!%p704_p3), %s208_s18, 16, %s989_s29, [#allocation6]  }
  0x23   : > { %s230_s27 = sshll.u32 %s1292_s5, 4  ;;  %s1277_s14 = sshll.u32 %s1121_s13, 6  ;;  %s231_s27 = int_to_ptr.vmem [resolvable:$true] %s230_s27 }
  0x24   : > { %712 = dma.vmem_to_smem (!%p704_p3), %s231_s27, 16, %s990_s30, [#allocation11]  }
  0x25   : > { %s1293_s0 = sld [smem:[#allocation20_spill]]  ;;  %s245_s18 = scalar_lea.vmem [#allocation3], %s1277_s14 }
  0x26   : > { %s252_s21 = sshll.u32 %s245_s18, 4  ;;  %s242_s22 = scalar_lea.sflag [#allocation4], %s1121_s13  ;;  %s253_s21 = int_to_ptr.vmem [resolvable:$true] %s252_s21 }
  0x27   : > { %p852_p8 = pneg %p1113_p7 }
  0x2b   : > { %s249_s17 = scalar_lea.hbm %s1293_s0, %s1278_s8  ;;  %s855_s16 = scalar_lea.hbm %s1293_s0, 128 }
  0x2c   : > { %s250_s20 = sshll.u32 %s249_s17, 4  ;;  %s251_s20 = int_to_ptr.hbm [resolvable:$true] %s250_s20 }
  0x2d   : > { %s848_s27 = sshra.s32 %s251_s20, 4  ;;  %s849_s27 = int_to_ptr.hbm [resolvable:$true] %s848_s27 }
  0x2e   : > { %s850_s29 = scalar_lea.hbm %s849_s27, 64  ;;  %p856_p1 = scmp.lt.s32.totalorder %s849_s27, %s1293_s0 }
  0x2f   : > { %p851_p5 = scmp.ne.s32.totalorder %s849_s27, %s850_s29  ;;  %p857_p2 = scmp.lt.s32.totalorder %s855_s16, %s850_s29 }
  0x31   : > { %p853_p9 = pnand %p852_p8, %p851_p5  ;;  %p858_p3 = por %p857_p2, %p856_p1 }
  0x33   : > { %p854_p10 = pneg %p853_p9 }
  0x35   : > { %p859_p0 = pnand %p858_p3, %p854_p10 }
  0x37   : > { %862 = shalt.err (!%p859_p0)
}
  0x38   : > { %s991_s18 = smov 256   ;;  %s992_s8 = smov 128  }
  0x39   : > { %s993_s2 = smov 8   ;;  %s1294_s30 = sshll.u32 %s986_s26, 3 }
  0x3a   : > { %716 = dma.hbm_to_vmem [thread:$0]  (!%p1113_p7), %s251_s20, 1024, %s253_s21, %s242_s22, %s991_s18, %s992_s8, %s993_s2  }
  0x3b   : > { %s270_s14 = scalar_lea.hbm %s1271_s1, %s1294_s30  ;;  %s1295_s29 = sshll.u32 %s1121_s13, 6 }
  0x3c   : > { %s271_s27 = sshll.u32 %s270_s14, 4  ;;  %s266_s16 = scalar_lea.vmem [#allocation7], %s1295_s29  ;;  %s272_s27 = int_to_ptr.hbm [resolvable:$true] %s271_s27 }
  0x3d   : > { %s273_s17 = sshll.u32 %s266_s16, 4  ;;  %s263_s0 = scalar_lea.sflag [#allocation8], %s1121_s13  ;;  %s274_s17 = int_to_ptr.vmem [resolvable:$true] %s273_s17 }
  0x3e   : > { %s878_s5 = sshra.s32 %s272_s27, 4  ;;  %s885_s3 = scalar_lea.hbm %s1271_s1, 128  ;;  %s879_s5 = int_to_ptr.hbm [resolvable:$true] %s878_s5 }
  0x3f   : > { %s880_s7 = scalar_lea.hbm %s879_s5, 64  ;;  %p886_p10 = scmp.lt.s32.totalorder %s879_s5, %s1271_s1 }
  0x40   : > { %p881_p0 = scmp.ne.s32.totalorder %s879_s5, %s880_s7  ;;  %p887_p1 = scmp.lt.s32.totalorder %s885_s3, %s880_s7 }
  0x42   : > { %p883_p5 = pnand %p881_p0, %p852_p8  ;;  %p888_p2 = por %p887_p1, %p886_p10 }
  0x44   : > { %p884_p9 = pneg %p883_p5 }
  0x46   : > { %p889_p3 = pnand %p888_p2, %p884_p9 }
  0x48   : > { %892 = shalt.err (!%p889_p3)
}
  0x49   : > { %719 = dma.hbm_to_vmem [thread:$0]  (!%p1113_p7), %s272_s27, 1024, %s274_s17, %s263_s0, %s991_s18, %s992_s8, %s993_s2  }
  0x4a   : > { %285 = sbr.rel (%p1095_p13) target bundleno = 162 (0xa2), region = 44  ;;  %s1168_s13 = sand.u32 (!%p1095_p13), 1, %s978_s24  }
  0x4b   : > { %s653_s15 = sshll.u32 (!%p1095_p13), %s1168_s13, 6  ;;  %s288_s14 = scalar_lea.sflag (!%p1095_p13), [#allocation4], %s1168_s13 }
  0x4c   : > { %s1172_s29 = scalar_lea.vmem (!%p1095_p13), [#allocation3], %s653_s15 }
  0x4f   : > { %953 = dma.done.wait (%p1080_p6), %s288_s14, 1024  }
  0x50   : > { %955 = vsyncadd (%p1080_p6), %s288_s14, 4294966272  ;;  %s298_s0 = scalar_lea.sflag [#allocation8], %s1168_s13  ;;  %s1179_s2 = scalar_lea.vmem [#allocation7], %s653_s15 }
  0x51   : > { %957 = dma.done.wait (%p1080_p6), %s298_s0, 1024  }
  0x52   : > { %959 = vsyncadd (%p1080_p6), %s298_s0, 4294966272 }
  0x53   : > { %961 = dma.done.wait (%p49_p4), [#allocation6], 16  }
  0x54   : > { %963 = vsyncadd (%p49_p4), [#allocation6], 4294967280 }
  0x55   : > { %965 = dma.done.wait (%p49_p4), [#allocation11], 32  }
  0x56   : > { %967 = vsyncadd (%p49_p4), [#allocation11], 4294967264 }
  0x57   : > { %322 = sfence }
  0x58   : > { %v671_v0 = vld [vmem:[%s1179_s2 + $0x8] sm:$0xff]  ;;  %v672_v1 = vld [vmem:[%s1179_s2 + $0x18] sm:$0xff]  ;;  %s1197_s5 = sld [smem:[#allocation9]]  ;;  %v383_v39 = vld [vmem:[%s1179_s2] sm:$0xff]  ;;  %s658_s3 = sshll.u32 %s1168_s13, 4 }
  0x59   : > { %v673_v2 = vld [vmem:[%s1179_s2 + $0x28] sm:$0xff]  ;;  %v674_v3 = vld [vmem:[%s1179_s2 + $0x38] sm:$0xff]  ;;  %v392_v4 = vadd.f32 1e-06, %v671_v0  ;;  %v393_v5 = vadd.f32 1e-06, %v672_v1 }
  0x5a   : > { %v394_v6 = vadd.f32 1e-06, %v673_v2  ;;  %v395_v7 = vadd.f32 1e-06, %v674_v3  ;;  %s1199_s7 = sld [smem:[#allocation9 + $0x1]]  ;;  %v384_v52 = vld [vmem:[%s1179_s2 + $0x10] sm:$0xff] }
  0x5b   : > { %v400_v8 = vand.u32 2147483647, %v392_v4  ;;  %v401_v9 = vand.u32 2147483647, %v393_v5  ;;  %s1201_s9 = sld [smem:[#allocation9 + $0x2]]  ;;  %v396_v28 = vmin.f32 %v392_v4, 0.0 }
  0x5c   : > { %v402_v10 = vand.u32 2147483647, %v394_v6  ;;  %v403_v11 = vand.u32 2147483647, %v395_v7  ;;  %s1203_s12 = sld [smem:[#allocation9 + $0x3]]  ;;  %v397_v30 = vmin.f32 %v393_v5, 0.0 }
  0x5d   : > { %v404_v12 = vsub.f32 0.0, %v400_v8  ;;  %v405_v13 = vsub.f32 0.0, %v401_v9  ;;  %s1205_s19 = sld [smem:[#allocation2]]  ;;  %v398_v32 = vmin.f32 %v394_v6, 0.0  ;;  %v399_v35 = vmin.f32 %v395_v7, 0.0  ;;  %v385_v62 = vld [vmem:[%s1179_s2 + $0x20] sm:$0xff] }
  0x5e   : > { %v406_v14 = vsub.f32 0.0, %v402_v10  ;;  %v407_v15 = vsub.f32 0.0, %v403_v11  ;;  %v434_v37 = vstv %s1197_s5  ;;  %s1211_s8 = sld [smem:[#allocation10]]  ;;  %v386_v4 = vld [vmem:[%s1179_s2 + $0x30] sm:$0xff]  ;;  %s682_s22 = sshll.u32 %s1056_s4, 3 }
  0x5f   : > { %v408_v16 = vmul.f32 1.442695, %v404_v12  ;;  %v410_v17 = vmul.f32 1.442695, %v405_v13  ;;  %v435_v50 = vmul.f32 %v434_v37, %v383_v39  ;;  %s676_s18 = sld [smem:[#allocation10 + $0x1]]  ;;  %v663_v12 = vld [vmem:[%s1172_s29 + $0x10] sm:$0xff]  ;;  %s511_s14 = scalar_lea.hbm %s1276_s6, %s682_s22 }
  0x60   : > { %v412_v18 = vmul.f32 1.442695, %v406_v14  ;;  %v414_v19 = vmul.f32 1.442695, %v407_v15  ;;  %v445_v42 = vstv %s1199_s7  ;;  %s678_s27 = sld [smem:[#allocation10 + $0x2]]  ;;  %v667_v13 = vld [vmem:[%s1172_s29 + $0x18] sm:$0xff] }
  0x61   : > { %773 = vpow2.f32 %v408_v16  ;;  %v456_v45 = vstv %s1201_s9  ;;  %s1216_s16 = sld [smem:[#allocation10 + $0x3]]  ;;  %v446_v60 = vmul.f32 %v445_v42, %v384_v52  ;;  %s514_s4 = sshll.u32 %s511_s14, 4  ;;  %s515_s4 = int_to_ptr.hbm [resolvable:$true] %s514_s4 }
  0x62   : > { %775 = vpow2.f32 %v410_v17  ;;  %v467_v48 = vstv %s1203_s12  ;;  %v457_v2 = vmul.f32 %v456_v45, %v385_v62  ;;  %v661_v17 = vld [vmem:[%s1172_s29 + $0x8] sm:$0xff]  ;;  %s1228_s17 = sld [smem:[#allocation12 + $0x2]]  ;;  %s501_s2 = scalar_lea.sflag [#allocation5], %s1168_s13 }
  0x63   : > { %777 = vpow2.f32 %v412_v18  ;;  %v436_v53 = vstv %s1205_s19  ;;  %v468_v16 = vmul.f32 %v467_v48, %v386_v4  ;;  %s1230_s20 = sld [smem:[#allocation12]]  ;;  %s922_s5 = sshra.s32 %s515_s4, 4  ;;  %s923_s5 = int_to_ptr.hbm [resolvable:$true] %s922_s5 }
  0x64   : > { %779 = vpow2.f32 %v414_v19  ;;  %v437_v59 = vadd.f32 %v436_v53, %v435_v50  ;;  %v442_v63 = vstv %s1211_s8  ;;  %s659_s21 = sld [smem:[#allocation12 + $0x1]]  ;;  %s924_s7 = scalar_lea.hbm %s923_s5, 16 }
  0x65   : > { %v452_v1 = vstv %s676_s18  ;;  %p925_p4 = scmp.ne.s32.totalorder %s923_s5, %s924_s7  ;;  %s928_s19 = scalar_lea.hbm %s1276_s6, 32 }
  0x66   : > { %v447_v0 = vadd.f32 %v446_v60, %v437_v59  ;;  %v463_v5 = vstv %s678_s27  ;;  %p929_p7 = scmp.lt.s32.totalorder %s923_s5, %s1276_s6  ;;  %p930_p8 = scmp.lt.s32.totalorder %s928_s19, %s924_s7 }
  0x67   : > { %v774_v20 = vpop.eup %773  ;;  %v474_v8 = vstv %s1216_s16  ;;  %p926_p6 = pnand %p925_p4, %p1087_p11 }
  0x68   : > { %v776_v21 = vpop.eup %775  ;;  %v416_v22 = vadd.f32 1.0, %v774_v20  ;;  %v458_v14 = vadd.f32 %v457_v2, %v447_v0  ;;  %v664_v20 = vld [vmem:[%s1172_s29 + $0x30] sm:$0xff]  ;;  %p931_p0 = por %p930_p8, %p929_p7 }
  0x69   : > { %v778_v23 = vpop.eup %777  ;;  %v417_v24 = vadd.f32 1.0, %v776_v21  ;;  %v668_v21 = vld [vmem:[%s1172_s29 + $0x38] sm:$0xff]  ;;  %p927_p13 = pneg %p926_p6 }
  0x6a   : > { %v780_v25 = vpop.eup %779  ;;  %v418_v26 = vadd.f32 1.0, %v778_v23  ;;  %781 = vlog2.f32 %v416_v22  ;;  %v662_v22 = vld [vmem:[%s1172_s29 + $0x28] sm:$0xff]  ;;  %v665_v23 = vadd.f32 -1.0, %v663_v12 }
  0x6b   : > { %v419_v27 = vadd.f32 1.0, %v780_v25  ;;  %783 = vlog2.f32 %v417_v24  ;;  %v669_v24 = vadd.f32 -1.0, %v667_v13  ;;  %p932_p5 = pnand %p931_p0, %p927_p13 }
  0x6c   : > { %785 = vlog2.f32 %v418_v26  ;;  %v469_v26 = vadd.f32 %v468_v16, %v458_v14 }
  0x6d   : > { %787 = vlog2.f32 %v419_v27  ;;  %v666_v27 = vadd.f32 -1.0, %v664_v20 }
  0x70   : > { %v782_v29 = vpop.eup %781 }
  0x71   : > { %v784_v31 = vpop.eup %783  ;;  %v421_v33 = vmul.f32 0.6931472, %v782_v29  ;;  %v355_v29 = vld [vmem:[%s1172_s29] sm:$0xff] }
  0x72   : > { %v786_v34 = vpop.eup %785  ;;  %v423_v36 = vmul.f32 0.6931472, %v784_v31  ;;  %v356_v31 = vld [vmem:[%s1172_s29 + $0x20] sm:$0xff]  ;;  %s351_s29 = scalar_lea.vmem [#allocation13], %s658_s3 }
  0x73   : > { %v788_v38 = vpop.eup %787  ;;  %v425_v40 = vmul.f32 0.6931472, %v786_v34  ;;  %v428_v41 = vsub.f32 %v396_v28, %v421_v33  ;;  %v670_v28 = vadd.f32 -1.0, %v668_v21  ;;  %v372_v33 = vmul.f32 %v669_v24, %v669_v24  ;;  %s512_s0 = sshll.u32 %s351_s29, 4  ;;  %s513_s0 = int_to_ptr.vmem [resolvable:$true] %s512_s0 }
  0x74   : > { %v427_v43 = vmul.f32 0.6931472, %v788_v38  ;;  %v429_v44 = vsub.f32 %v397_v30, %v423_v36  ;;  %v371_v36 = vmul.f32 %v666_v27, %v666_v27  ;;  %v478_v38 = vsub.f32 %v356_v31, %v469_v26 }
  0x75   : > { %v430_v46 = vsub.f32 %v398_v32, %v425_v40  ;;  %v439_v47 = vmul.f32 %v434_v37, %v428_v41  ;;  %v370_v32 = vmul.f32 %v665_v23, %v665_v23  ;;  %v373_v37 = vmul.f32 %v670_v28, %v670_v28 }
  0x76   : > { %v431_v49 = vsub.f32 %v399_v35, %v427_v43  ;;  %v449_v51 = vmul.f32 %v445_v42, %v429_v44  ;;  %v477_v35 = vsub.f32 %v355_v29, %v469_v26  ;;  %v376_v42 = vstv %s1228_s17 }
  0x77   : > { %v440_v54 = vmul.f32 1.442695, %v439_v47  ;;  %v460_v55 = vmul.f32 %v456_v45, %v430_v46  ;;  %v374_v41 = vadd.f32 %v372_v33, %v370_v32  ;;  %v375_v44 = vadd.f32 %v373_v37, %v371_v36 }
  0x78   : > { %v450_v56 = vmul.f32 1.442695, %v449_v51  ;;  %v471_v57 = vmul.f32 %v467_v48, %v431_v49  ;;  %v479_v43 = vand.u32 2147483647, %v477_v35  ;;  %v480_v45 = vand.u32 2147483647, %v478_v38 }
  0x79   : > { %789 = vpow2.f32 %v440_v54  ;;  %v461_v58 = vmul.f32 1.442695, %v460_v55  ;;  %v481_v46 = vstv %s1230_s20  ;;  %v377_v50 = vmul.f32 %v376_v42, %v374_v41 }
  0x7a   : > { %791 = vpow2.f32 %v450_v56  ;;  %v472_v61 = vmul.f32 1.442695, %v471_v57  ;;  %v482_v51 = vmul.f32 %v481_v46, %v479_v43  ;;  %v378_v53 = vmul.f32 %v376_v42, %v375_v44 }
  0x7b   : > { %793 = vpow2.f32 %v461_v58  ;;  %v483_v54 = vmul.f32 %v481_v46, %v480_v45  ;;  %v493_v57 = vstv %s659_s21 }
  0x7c   : > { %795 = vpow2.f32 %v472_v61  ;;  %v484_v58 = vadd.f32 %v482_v51, %v377_v50 }
  0x7d   : > { %797 = vlog2.f32 %v661_v17  ;;  %v485_v60 = vadd.f32 %v483_v54, %v378_v53 }
  0x7e   : > { %799 = vlog2.f32 %v662_v22 }
  0x7f   : > { %v790_v3 = vpop.eup %789 }
  0x80   : > { %v792_v6 = vpop.eup %791  ;;  %v443_v7 = vmul.f32 %v790_v3, %v442_v63 }
  0x81   : > { %v794_v9 = vpop.eup %793  ;;  %v453_v10 = vmul.f32 %v792_v6, %v452_v1 }
  0x82   : > { %v796_v11 = vpop.eup %795  ;;  %v464_v15 = vmul.f32 %v794_v9, %v463_v5 }
  0x83   : > { %v454_v18 = vadd.f32 %v453_v10, %v443_v7  ;;  %v475_v19 = vmul.f32 %v796_v11, %v474_v8  ;;  %v798_v39 = vpop.eup %797 }
  0x84   : > { %v800_v40 = vpop.eup %799  ;;  %v380_v47 = vmul.f32 0.6931472, %v798_v39 }
  0x85   : > { %v465_v25 = vadd.f32 %v464_v15, %v454_v18  ;;  %v382_v48 = vmul.f32 0.6931472, %v800_v40 }
  0x87   : > { %v476_v30 = vadd.f32 %v475_v19, %v465_v25 }
  0x89   : > { %v486_v34 = vadd.f32 1e-06, %v476_v30 }
  0x8b   : > { %801 = vlog2.f32 %v486_v34 }
  0x91   : > { %v802_v49 = vpop.eup %801 }
  0x92   : > { %v488_v52 = vmul.f32 0.6931472, %v802_v49 }
  0x94   : > { %v489_v55 = vsub.f32 %v380_v47, %v488_v52  ;;  %v490_v56 = vsub.f32 %v382_v48, %v488_v52 }
  0x96   : > { %v491_v59 = vand.u32 2147483647, %v489_v55  ;;  %v492_v61 = vand.u32 2147483647, %v490_v56 }
  0x98   : > { %v494_v62 = vmul.f32 %v493_v57, %v491_v59  ;;  %v495_v63 = vmul.f32 %v493_v57, %v492_v61 }
  0x9a   : > { %v496_v0 = vadd.f32 %v494_v62, %v484_v58  ;;  %v497_v1 = vadd.f32 %v495_v63, %v485_v60 }
  0x9c   : > { %498 = vst [vmem:[%s351_s29] sm:$0xff] %v496_v0 }
  0x9d   : > { %499 = vst [vmem:[%s351_s29 + $0x8] sm:$0xff] %v497_v1 }
  0x9e   : > { %935 = shalt.err (!%p932_p5)
}
  0x9f   : > { %s994_s13 = smov 128   ;;  %s995_s27 = smov 256  }
  0xa0   : > { %s996_s16 = smov 8  }
  0xa1   : > { %701 = dma.vmem_to_hbm [thread:$0]  (%p1087_p11), %s513_s0, 256, %s515_s4, %s501_s2, %s994_s13, %s995_s27, %s996_s16  }
  0xa2 PF: > { %s529_s17 = sand.u32 1, %s974_s23   ;;  %p1296_p9 = scmp.ge.s32.totalorder %s986_s26, 2 }
  0xa3   : > { %s530_s20 = scalar_lea.sflag [#allocation5], %s529_s17 }
  0xa4   : > { %p721_p10 = pnand %p1296_p9, %p1091_p12 }
  0xa6   : > { %p722_p1 = pneg %p721_p10 }
  0xa8   : > { %969 = dma.done.wait (%p722_p1), %s530_s20, 256  }
  0xa9   : > { %971 = vsyncadd (%p722_p1), %s530_s20, 4294967040  ;;  %s1297_s21 = sld [smem:[#allocation19_spill]]  ;;  %p25_p2 = scmp.ge.s32.totalorder %s1060_s28, 4  }
  0xaa   : > { %s1298_s23 = smov %s978_s24  ;;  %s1299_s24 = smov %s982_s25 }
  0xab   : > { %s1301_s26 = smov %s1060_s28  ;;  %27 = sbr.rel (!%p25_p2) target bundleno = 15 (0xf), region = 119 }
  0xaf   : > { %s1300_s25 = smov %s1297_s21 }
  0xb0   :  { %536 = vsyncpa [#allocation4], 1 }
  0xb1   :  { %538 = vsyncpa [#allocation4 + $0x1], 1 }
  0xb2   :  { %539 = vsyncpa [#allocation8], 1 }
  0xb3   :  { %541 = vsyncpa [#allocation8 + $0x1], 1 }
  0xb4   :  { %542 = vsyncpa [#allocation5], 1 }
  0xb5   :  { %544 = vsyncpa [#allocation5 + $0x1], 1 }
  0xb6   :  { %545 = vsyncpa [#allocation6], 1 }
  0xb7   :  { %547 = vsyncpa [#allocation6 + $0x1], 1 }
  0xb8   :  { %548 = vsyncpa [#allocation11], 1 }

</bundles_post_ra>
